<compile_context>
chip_gen: v5e
topology: v5e:2x2
jax: 0.10.0
libtpu: 0.0.40
codegen_flags: <defaults>
</compile_context>

<pallas_src>
import functools

import jax
import jax.numpy as jnp
from jax import lax
from jax.experimental import pallas as pl
from jax.experimental.pallas import tpu as pltpu


def _round_up(a, b):
    return (a + b - 1) // b * b


def _item_gather(x_col, item_tab_ref, *, v_chunk):
    """Gather-as-matmul: (T,1) int ids x (V,E) VMEM table -> (T,E) f32.

    If v_chunk is not None, the vocab axis is processed in v_chunk-wide slabs
    so the live one-hot never exceeds (T, v_chunk).
    """
    T = x_col.shape[0]
    V, E = item_tab_ref.shape

    if v_chunk is None:
        iota = lax.broadcasted_iota(jnp.int32, (T, V), 1)
        onehot = (iota == x_col).astype(item_tab_ref.dtype)
        return jnp.dot(onehot, item_tab_ref[...],
                       preferred_element_type=jnp.float32)

    n_chunks = V // v_chunk
    iota = lax.broadcasted_iota(jnp.int32, (T, v_chunk), 1)

    def body(c, acc):
        start = pl.multiple_of(c * v_chunk, v_chunk)
        tab = item_tab_ref[pl.ds(start, v_chunk), :]
        onehot = (iota == (x_col - c * v_chunk)).astype(tab.dtype)
        return acc + jnp.dot(onehot, tab, preferred_element_type=jnp.float32)

    return lax.fori_loop(0, n_chunks, body, jnp.zeros((T, E), jnp.float32))


def _embed_concat_kernel(x_ref, skip_ref, item_tab_ref, skip_tab_ref, out_ref,
                         *, emb_dim, skip_dim, v_chunk):
    # Item embedding: one-hot matmul on the MXU (tables resident in VMEM).
    item_emb = _item_gather(x_ref[...], item_tab_ref, v_chunk=v_chunk)  # (T,E) f32

    # Skip embedding: 2-row table -> pure VPU select, no MXU pass.
    skip = skip_ref[...]                                      # (T, 1) int32
    row0 = skip_tab_ref[0:1, :].astype(jnp.float32)           # (1, Es)
    row1 = skip_tab_ref[1:2, :].astype(jnp.float32)
    skip_emb = jnp.where(skip == 1, row1, row0)               # (T, Es) f32

    # Build the full lane-dense row in-regs and emit ONE full-width store.
    T = item_emb.shape[0]
    c = emb_dim + skip_dim
    c_pad = out_ref.shape[1]
    parts = [item_emb, skip_emb]
    if c_pad > c:
        parts.append(jnp.zeros((T, c_pad - c), jnp.float32))
    out_ref[...] = jnp.concatenate(parts, axis=-1).astype(out_ref.dtype)


def _embed_item_only_kernel(x_ref, item_tab_ref, out_ref, *, emb_dim, v_chunk):
    item_emb = _item_gather(x_ref[...], item_tab_ref, v_chunk=v_chunk)
    T = item_emb.shape[0]
    e_pad = out_ref.shape[1]
    if e_pad > emb_dim:
        item_emb = jnp.concatenate(
            [item_emb, jnp.zeros((T, e_pad - emb_dim), jnp.float32)], axis=-1)
    out_ref[...] = item_emb.astype(out_ref.dtype)


def _vmem_limit_bytes(tile, V, E, Es, c_pad, v_chunk):
    f32 = 4
    # Tables are whole-array VMEM resident -> single-buffered (1x).
    tables = V * _round_up(E, 128) * f32 + 8 * _round_up(max(Es, 1), 128) * f32
    idx = 2 * 2 * tile * 128 * f32          # x, skip tiles (double-buffered; 1 col pads to 128 lanes)
    out = 2 * tile * c_pad * f32            # lane-dense out tile (double-buffered)
    onehot = tile * _round_up(v_chunk or V, 128) * f32
    return int(min(tables + idx + out + onehot + (8 << 20), 100 << 20))


def embedding_layer_forward(x, skip_status, item_table, skip_table, *,
                            token_tile=1024, vocab_chunk="auto"):
    """Pallas implementation of EmbeddingLayer.forward."""
    B, S = x.shape
    V, E = item_table.shape
    _, Es = skip_table.shape
    with_skip = (skip_status.shape[1] == x.shape[1])
    out_dtype = item_table.dtype

    # ---- token tiling ------------------------------------------------------
    N = B * S
    # >= 2 grid steps so the "parallel" token axis shards across both v7x TCs,
    # and tile ~= N / num_tiles so the last tile is nearly full (low pad waste).
    num_tiles = max(2, pl.cdiv(N, token_tile))
    tile = _round_up(pl.cdiv(N, num_tiles), 8)
    N_pad = tile * num_tiles
    grid = (num_tiles,)

    # ---- vocab chunking for the one-hot gather -----------------------------
    if vocab_chunk == "auto":
        vocab_chunk = 512 if (V > 2048 and V % 512 == 0) else None
    if vocab_chunk is not None and not (0 < vocab_chunk < V and V % vocab_chunk == 0):
        vocab_chunk = None

    def _flatten_pad(a):
        a = a.astype(jnp.int32).reshape(N, 1)
        if N_pad != N:
            a = jnp.pad(a, ((0, N_pad - N), (0, 0)))
        return a

    x_flat = _flatten_pad(x)

    idx_spec = pl.BlockSpec((tile, 1), lambda i: (i, 0))
    # Whole-array VMEM residency: single copy, no pipeline double-buffering.
    tab_spec = pl.BlockSpec(memory_space=pltpu.MemorySpace.VMEM)

    if with_skip:
        C = E + Es
        C_pad = _round_up(C, 128)        # lane-dense output -> unmasked full vst
        skip_flat = _flatten_pad(skip_status)
        out2d = pl.pallas_call(
            functools.partial(_embed_concat_kernel, emb_dim=E, skip_dim=Es,
                              v_chunk=vocab_chunk),
            out_shape=jax.ShapeDtypeStruct((N_pad, C_pad), out_dtype),
            grid=grid,
            in_specs=[idx_spec, idx_spec, tab_spec, tab_spec],
            out_specs=pl.BlockSpec((tile, C_pad), lambda i: (i, 0)),
            compiler_params=pltpu.CompilerParams(
                dimension_semantics=("parallel",),
                vmem_limit_bytes=_vmem_limit_bytes(tile, V, E, Es, C_pad,
                                                   vocab_chunk)),
        )(x_flat, skip_flat, item_table, skip_table)
        return out2d[:N, :C].reshape(B, S, C)
    else:
        # Matches the PyTorch module's fallback: item embedding only.
        E_pad = _round_up(E, 128)
        out2d = pl.pallas_call(
            functools.partial(_embed_item_only_kernel, emb_dim=E,
                              v_chunk=vocab_chunk),
            out_shape=jax.ShapeDtypeStruct((N_pad, E_pad), out_dtype),
            grid=grid,
            in_specs=[idx_spec, tab_spec],
            out_specs=pl.BlockSpec((tile, E_pad), lambda i: (i, 0)),
            compiler_params=pltpu.CompilerParams(
                dimension_semantics=("parallel",),
                vmem_limit_bytes=_vmem_limit_bytes(tile, V, E, 0, E_pad,
                                                   vocab_chunk)),
        )(x_flat, item_table)
        return out2d[:N, :E].reshape(B, S, E)


if __name__ == "__main__":
    # Small, deterministic config consistent with the module's __init__:
    #   input_dim (vocab) = 64, embedding_dim = 32, skip_embedding_dim = 16
    B, S = 2, 8
    V, E, Es = 64, 32, 16

    key = jax.random.PRNGKey(0)
    k_item, k_skip, k_x, k_s = jax.random.split(key, 4)

    item_table = jax.random.normal(k_item, (V, E), dtype=jnp.float32)
    skip_table = jax.random.normal(k_skip, (2, Es), dtype=jnp.float32)

    x = jax.random.randint(k_x, (B, S), 0, V, dtype=jnp.int32)
    skip_status = jax.random.randint(k_s, (B, S), 0, 2, dtype=jnp.int32)

    ref_concat = jnp.concatenate([item_table[x], skip_table[skip_status]], axis=2)
    ref_item = item_table[x]

    # Main path: concat(item_emb, skip_emb) along channels.
    out = embedding_layer_forward(x, skip_status, item_table, skip_table)
    out = jax.block_until_ready(out)
    assert out.shape == (B, S, E + Es), out.shape
    assert jnp.allclose(out, ref_concat, atol=1e-5), "mismatch (concat path)"

    # Same path, exercising the vocab-chunked one-hot gather.
    out_ck = embedding_layer_forward(x, skip_status, item_table, skip_table,
                                     vocab_chunk=32)
    out_ck = jax.block_until_ready(out_ck)
    assert jnp.allclose(out_ck, ref_concat, atol=1e-5), "mismatch (chunked vocab)"

    # Fallback path: skip_status with mismatched seq length -> item emb only.
    skip_bad = jax.random.randint(k_s, (B, S // 2), 0, 2, dtype=jnp.int32)
    out_item = embedding_layer_forward(x, skip_bad, item_table, skip_table)
    out_item = jax.block_until_ready(out_item)
    assert out_item.shape == (B, S, E), out_item.shape
    assert jnp.allclose(out_item, ref_item, atol=1e-5), "mismatch (item-only path)"

    print("KERNEL_OK")
</pallas_src>

<mosaic_0001>
module attributes {stable_mosaic.version = 11 : i64} {
  func.func @_embed_concat_kernel(%arg0: i32, %arg1: memref<8x1xi32, #tpu.memory_space<vmem>>, %arg2: memref<8x1xi32, #tpu.memory_space<vmem>>, %arg3: memref<64x32xf32, #tpu.memory_space<vmem>>, %arg4: memref<2x16xf32, #tpu.memory_space<vmem>>, %arg5: memref<8x128xf32, #tpu.memory_space<vmem>>) attributes {dimension_semantics = [#tpu.dimension_semantics<parallel>], iteration_bounds = array<i64: 2>, scalar_prefetch = 0 : i64, scratch_operands = 0 : i64, tpu.core_type = #tpu.core_type<tc>, window_params = [{transform_indices = @transform_0, window_bounds = array<i64: 8, 1>}, {transform_indices = @transform_1, window_bounds = array<i64: 8, 1>}, {pipeline_mode = #tpu.pipeline_mode<synchronous>, transform_indices = @transform_2, window_bounds = array<i64: 64, 32>}, {pipeline_mode = #tpu.pipeline_mode<synchronous>, transform_indices = @transform_3, window_bounds = array<i64: 2, 16>}, {transform_indices = @transform_4, window_bounds = array<i64: 8, 128>}]} {
    %c0 = arith.constant 0 : index
    %c0_0 = arith.constant 0 : index
    %0 = vector.load %arg1[%c0, %c0_0] : memref<8x1xi32, #tpu.memory_space<vmem>>, vector<8x1xi32>
    %1 = tpu.iota {dimensions = array<i32: 1>} : vector<8x64xi32>
    %2 = vector.broadcast %0 : vector<8x1xi32> to vector<8x64xi32>
    %3 = arith.cmpi eq, %1, %2 : vector<8x64xi32>
    %4 = arith.extui %3 : vector<8x64xi1> to vector<8x64xi32>
    %5 = arith.sitofp %4 : vector<8x64xi32> to vector<8x64xf32>
    %c0_1 = arith.constant 0 : index
    %c0_2 = arith.constant 0 : index
    %6 = vector.load %arg3[%c0_1, %c0_2] : memref<64x32xf32, #tpu.memory_space<vmem>>, vector<64x32xf32>
    %cst = arith.constant dense<0.000000e+00> : vector<8x32xf32>
    %7 = tpu.matmul %5, %6, %cst {dimension_numbers = #tpu.dot_dimension_numbers<[1], [0], [0], [1], [0, 0, 1, 1], [], []>} : vector<8x64xf32>, vector<64x32xf32>, vector<8x32xf32> -> vector<8x32xf32>
    %c0_3 = arith.constant 0 : index
    %c0_4 = arith.constant 0 : index
    %8 = vector.load %arg2[%c0_3, %c0_4] : memref<8x1xi32, #tpu.memory_space<vmem>>, vector<8x1xi32>
    %c0_5 = arith.constant 0 : index
    %c0_6 = arith.constant 0 : index
    %9 = vector.load %arg4[%c0_5, %c0_6] : memref<2x16xf32, #tpu.memory_space<vmem>>, vector<1x16xf32>
    %c1 = arith.constant 1 : index
    %c0_7 = arith.constant 0 : index
    %10 = vector.load %arg4[%c1, %c0_7] : memref<2x16xf32, #tpu.memory_space<vmem>>, vector<1x16xf32>
    %c1_i32 = arith.constant 1 : i32
    %11 = vector.broadcast %c1_i32 : i32 to vector<8x1xi32>
    %12 = arith.cmpi eq, %8, %11 : vector<8x1xi32>
    %13 = vector.shape_cast %12 : vector<8x1xi1> to vector<8x1xi1>
    %14 = vector.broadcast %13 : vector<8x1xi1> to vector<8x16xi1>
    %15 = vector.shape_cast %10 : vector<1x16xf32> to vector<1x16xf32>
    %16 = vector.broadcast %15 : vector<1x16xf32> to vector<8x16xf32>
    %17 = vector.shape_cast %9 : vector<1x16xf32> to vector<1x16xf32>
    %18 = vector.broadcast %17 : vector<1x16xf32> to vector<8x16xf32>
    %19 = arith.select %14, %16, %18 : vector<8x16xi1>, vector<8x16xf32>
    %cst_8 = arith.constant 0.000000e+00 : f32
    %20 = vector.broadcast %cst_8 : f32 to vector<8x80xf32>
    %21 = tpu.concatenate %7, %19, %20 in 1 : vector<8x32xf32>, vector<8x16xf32>, vector<8x80xf32> -> vector<8x128xf32>
    %c0_9 = arith.constant 0 : index
    %c0_10 = arith.constant 0 : index
    %22 = vector.load %arg5[%c0_9, %c0_10] : memref<8x128xf32, #tpu.memory_space<vmem>>, vector<8x128xf32>
    tpu.vector_store %arg5[%c0_9, %c0_10], %21 {strides = array<i32>} : memref<8x128xf32, #tpu.memory_space<vmem>>, vector<8x128xf32>,
    return
  }
  func.func @transform_0(%arg0: i32) -> (i32, i32) {
    %c0_i32 = arith.constant 0 : i32
    %c0_i32_0 = arith.constant 0 : i32
    return %arg0, %c0_i32 : i32, i32
  }
  func.func @transform_1(%arg0: i32) -> (i32, i32) {
    %c0_i32 = arith.constant 0 : i32
    %c0_i32_0 = arith.constant 0 : i32
    return %arg0, %c0_i32 : i32, i32
  }
  func.func @transform_2(%arg0: i32) -> (i32, i32) {
    %c0_i32 = arith.constant 0 : i32
    %c0_i32_0 = arith.constant 0 : i32
    %c0_i32_1 = arith.constant 0 : i32
    return %c0_i32, %c0_i32_0 : i32, i32
  }
  func.func @transform_3(%arg0: i32) -> (i32, i32) {
    %c0_i32 = arith.constant 0 : i32
    %c0_i32_0 = arith.constant 0 : i32
    %c0_i32_1 = arith.constant 0 : i32
    return %c0_i32, %c0_i32_0 : i32, i32
  }
  func.func @transform_4(%arg0: i32) -> (i32, i32) {
    %c0_i32 = arith.constant 0 : i32
    %c0_i32_0 = arith.constant 0 : i32
    return %arg0, %c0_i32 : i32, i32
  }
}

</mosaic_0001>

<bundles_post_ra>
// kernel: tpu_custom_call.1
= control target key start
LH: loop header
LB: loop body
LE: loop exit
PB: predicated region body
PF: predicated region fallthrough
CT: control target
= control target key end

     0   :  { %9 = vsyncpa [#allocation3], 0  ;;  %s627_s0 = inlined_call_operand.vmem [shape: s32[16,1], index: 0, kind: input, shape index: {}]   ;;  %s628_s1 = inlined_call_operand.vmem [shape: s32[16,1], index: 1, kind: input, shape index: {}]   ;;  %s629_s2 = inlined_call_operand.vmem [shape: f32[64,32], index: 2, kind: input, shape index: {}]   ;;  %s630_s3 = inlined_call_operand.vmem [shape: f32[2,16], index: 3, kind: input, shape index: {}]   ;;  %s631_s4 = inlined_call_operand.hbm [shape: f32[16,128], index: 4, kind: output, shape index: {}]  }
   0x1   :  { %11 = vsyncpa [#allocation3 + $0x1], 0  ;;  %s509_s15 = smov 0   ;;  %s511_s16 = smov 0  }
   0x2   :  { %s513_s17 = smov 0   ;;  %s515_s18 = smov 0  }
   0x3 LB: > { %s530_s19 = sadd.s32 4294967295, %s479_s18   ;;  %s359_s20 = sadd.s32 4294967294, %s479_s18   ;;  %s479_s18 = sphi %s515_s18, %s637_s18   ;;  %s475_s17 = sphi %s513_s17, %s636_s17   ;;  %s471_s16 = sphi %s511_s16, %s635_s16   ;;  %s467_s15 = sphi %s509_s15, %s634_s15  }
   0x4   : > { %s534_s21 = sadd.s32 1, %s479_s18   ;;  %s118_s22 = sadd.s32 1, %s475_s17 }
   0x5   : > { %s115_s23 = ssub.s32 %s479_s18, %s534_s21  ;;  %p128_p0 = scmp.ne.s32.totalorder %s475_s17, %s471_s16 }
   0x6   : > { %p116_p1 = scmp.eq.s32.totalorder %s115_s23, 0  ;;  %p129_p2 = scmp.eq.s32.totalorder %s530_s19, 1 }
   0x7   : > { %p134_p3 = scmp.ne.s32.totalorder %s471_s16, %s467_s15  ;;  %p135_p4 = scmp.eq.s32.totalorder %s359_s20, 1 }
   0x8   : > { %s545_s24 = scalar_select %p116_p1, %s475_s17, %s118_s22  }
   0x9   : > { %p547_p5 = por %p129_p2, %p128_p0  ;;  %p551_p6 = por %p135_p4, %p134_p3 }
   0xa   : > { %p362_p7 = scmp.ge.s32.totalorder %s479_s18, 1  ;;  %p173_p8 = scmp.lt.s32.totalorder %s479_s18, 3 }
   0xc   : > { %p174_p9 = pnand %p362_p7, %p173_p8 }
   0xd   : > { %p202_p10 = scmp.lt.s32.totalorder (!%p174_p9), %s530_s19, 1  ;;  %s483_s12 = smov (!%p174_p9), 32  }
   0xe   : > { %177 = sbr.rel (%p174_p9) target bundleno = 273 (0x111), region = 36  ;;  %s369_s20 = sshll.u32 (!%p174_p9), %s530_s19, 3 }
   0xf   : > { %s283_s27 = scalar_lea.hbm (!%p174_p9), %s631_s4, %s369_s20  ;;  %s437_s9 = scalar_lea.hbm (!%p174_p9), %s631_s4, 16 }
  0x10   : > { %s287_s30 = sshll.u32 (!%p174_p9), %s283_s27, 4  ;;  %s288_s30 = int_to_ptr.hbm [resolvable:$true] %s287_s30 }
  0x11   : > { %s431_s6 = sshra.s32 (!%p174_p9), %s288_s30, 4  ;;  %s432_s6 = int_to_ptr.hbm [resolvable:$true] %s431_s6 }
  0x12   : > { %p438_p0 = scmp.lt.s32.totalorder (!%p174_p9), %s432_s6, %s631_s4 }
  0x13   : > { %v226_v0 = vld [vmem:[%s629_s2 + $0x38] sm:$0xff]  ;;  %v225_v1 = vld [vmem:[%s629_s2 + $0x30] sm:$0xff]  ;;  %v481_v2 = vmov 0   ;;  %s203_s5 = scalar_select %p202_p10, %s530_s19, 1  ;;  %v224_v3 = vld [vmem:[%s629_s2 + $0x28] sm:$0xff]  ;;  %v211_v12 = vlaneseq  ;;  %vm227_vm1 = vcmask 523264  }
  0x14   : > { %414 = vset.pattern.permute.xlu0 %v481_v2  ;;  %239 = vmatpush.msra.mxu0 %v226_v0  ;;  %v223_v4 = vld [vmem:[%s629_s2 + $0x20] sm:$0xff]  ;;  %v222_v7 = vld [vmem:[%s629_s2 + $0x18] sm:$0xff]  ;;  %v221_v8 = vld [vmem:[%s629_s2 + $0x10] sm:$0xff]  ;;  %v482_v15 = vmov 0.0   ;;  %vm267_vm4 = vcmask 261120   ;;  %vm269_vm5 = vcmask 392192  }
  0x15   : > { %s364_s8 = sshll.u32 %s203_s5, 3  ;;  %v220_v9 = vld [vmem:[%s629_s2 + $0x8] sm:$0xff]  ;;  %v219_v11 = vld [vmem:[%s629_s2] sm:$0xff]  ;;  %v212_v13 = vand.u32 127, %v211_v12  ;;  %s433_s19 = scalar_lea.hbm %s432_s6, 8 }
  0x16   : > { %240 = vmatpush.msra.mxu0 %v225_v1  ;;  %s209_s13 = scalar_lea.vmem %s628_s1, %s364_s8  ;;  %s205_s22 = scalar_lea.vmem %s627_s0, %s364_s8  ;;  %v415_v17 = vld [vmem:[%s630_s3 + $0x1] ss:$0 sm:$0xff]  ;;  %v416_v18 = vld [vmem:[%s630_s3] ss:$0 sm:$0xff] }
  0x17   : > { %v251_v5 = vld [vmem:[%s209_s13] sm:$0xff]  ;;  %s199_s13 = sand.u32 1, %s471_s16   ;;  %p434_p11 = scmp.ne.s32.totalorder %s432_s6, %s433_s19 }
  0x18   : > { %241 = vmatpush.msra.mxu0 %v224_v3  ;;  %v210_v6 = vld [vmem:[%s205_s22] sm:$0xff]  ;;  %vm254_vm0 = vcmp.eq.s32.totalorder %v251_v5, 1  ;;  %s363_s14 = sshll.u32 %s199_s13, 3  ;;  %s273_s5 = scalar_lea.sflag [#allocation3], %s199_s13 }
  0x19   : > { %214 = vperm.xlu0 %414, %v210_v6   ;;  %v255_v10 = vsel %vm254_vm0, 1, %v481_v2  ;;  %s201_s28 = scalar_lea.vmem [#allocation2], %s363_s14  ;;  %p435_p12 = pnand %p434_p11, %p547_p5 }
  0x1a   : > { %242 = vmatpush.msra.mxu0 %v223_v4  ;;  %s285_s29 = sshll.u32 %s201_s28, 4  ;;  %p439_p1 = scmp.lt.s32.totalorder %s437_s9, %s433_s19  ;;  %s286_s29 = int_to_ptr.vmem [resolvable:$true] %s285_s29 }
  0x1b   : > { %p436_p13 = pneg %p435_p12 }
  0x1c   : > { %243 = vmatpush.msra.mxu0 %v222_v7  ;;  %p440_p2 = por %p439_p1, %p438_p0 }
  0x1e   : > { %244 = vmatpush.msra.mxu0 %v221_v8  ;;  %p441_p3 = pnand %p440_p2, %p436_p13 }
  0x20   : > { %245 = vmatpush.msra.mxu0 %v220_v9 }
  0x21   : > { %257 = vperm.xlu0 %414, %v255_v10  }
  0x22   : > { %246 = vmatpush.msra.mxu0 %v219_v11 }
  0x8b   : > { %v215_v14 = vpop.permute.xlu0 %214 }
  0x8c   : > { %vm216_vm2 = vcmp.eq.s32.totalorder %v212_v13, %v215_v14 }
  0x8d   : > { %v366_v16 = vsel %vm216_vm2, 1.0, %v482_v15 }
  0x8e   : > { %367 = vmatmul.msk.f32.vlgmr.msra.gmra.mxu0 %vm227_vm1, %v366_v16 }
  0x93   : > { %v258_v19 = vpop.permute.xlu0 %257 }
  0x94   : > { %vm259_vm3 = vcmp.eq.s32.totalorder %v258_v19, 1 }
  0x95   : > { %v262_v20 = vsel %vm259_vm3, %v415_v17, %v416_v18 }
  0x96   : > { %264 = vrot.lane.b32.xlu1 %v262_v20, %s483_s12 }
 0x108   : > { %v265_v21 = vpop.permute.xlu1 %264 }
 0x10b   : > { %v248_v22 = vpop.f32.mrf.mxu0 }
 0x10c   : > { %v268_v23 = vsel %vm267_vm4, %v248_v22, %v265_v21 }
 0x10d   : > { %v270_v24 = vsel %vm269_vm5, %v268_v23, 0.0 }
 0x10e   : > { %271 = vst [vmem:[%s201_s28] sm:$0xff] %v270_v24 }
 0x10f   : > { %444 = shalt.err (!%p441_p3)
}
 0x110   : > { %372 = dma.vmem_to_hbm [thread:$0]  (%p547_p5), %s286_s29, 128, %s288_s30, %s273_s5  }
 0x111 PF: > { %p378_p4 = scmp.ge.s32.totalorder %s479_s18, 2  ;;  %s299_s12 = sand.u32 1, %s467_s15  }
 0x112   : > { %s300_s13 = scalar_lea.sflag [#allocation3], %s299_s12 }
 0x113   : > { %p375_p7 = pnand %p378_p4, %p551_p6 }
 0x115   : > { %p376_p8 = pneg %p375_p7 }
 0x117   : > { %462 = dma.done.wait (%p376_p8), %s300_s13, 128  }
 0x118   : > { %464 = vsyncadd (%p376_p8), %s300_s13, 4294967168  ;;  %p14_p9 = scmp.ge.s32.totalorder %s534_s21, 4   ;;  %s634_s15 = smov %s471_s16 }
 0x119   : > { %s635_s16 = smov %s475_s17  ;;  %s636_s17 = smov %s545_s24 }
 0x11a   : > { %s637_s18 = smov %s534_s21  ;;  %16 = sbr.rel (!%p14_p9) target bundleno = 3 (0x3), region = 74 }
 0x11f   :  { %306 = vsyncpa [#allocation3], 1 }
 0x120   :  { %308 = vsyncpa [#allocation3 + $0x1], 1 }

</bundles_post_ra>
